<compile_context>
chip_gen: v5e
topology: v5e:2x2
jax: 0.10.0
libtpu: 0.0.40
codegen_flags: <defaults>
</compile_context>

<pallas_src>
import functools

import jax
import jax.numpy as jnp
from jax.experimental import pallas as pl
from jax.experimental.pallas import tpu as pltpu


def _hidden_sizes(num_features: int, size_out: int, num_hidden: int):
    step = max(int((num_features - size_out) / (num_hidden + 1)), 1)
    return [max(num_features - i * step, size_out) for i in range(1, num_hidden + 1)]


def _round_up(x: int, m: int) -> int:
    return ((x + m - 1) // m) * m


# ---------------------------------------------------------------------------
# Kernel
# ---------------------------------------------------------------------------
def padded_encoder_kernel(*refs, num_layers: int, compute_dtype):
    """refs = (x_ref, w0, b0, w1, b1, ..., w_last, b_last, o_ref)."""
    x_ref = refs[0]
    o_ref = refs[-1]
    wb = refs[1:-1]

    h = x_ref[...].astype(compute_dtype)
    for l in range(num_layers):                      # unrolled at trace time
        w = wb[2 * l][...]
        b = wb[2 * l + 1][...]                        # biases kept in f32
        h = jnp.dot(h, w, preferred_element_type=jnp.float32) + b
        if l < num_layers - 1:
            h = jnp.maximum(h, 0.0).astype(compute_dtype)   # ReLU (dropout p=0)
    # Last layer already includes the zero-padded columns -> direct store.
    o_ref[...] = h.astype(o_ref.dtype)


# ---------------------------------------------------------------------------
# Parameter preparation (pad-fold + sublane-friendly hidden dims)
# ---------------------------------------------------------------------------
def prepare_params(raw_params, *, size_out: int, size_padding: int):
    """raw_params: list of (w[in,out] f32, b[1,out] f32).

    Returns kernel-ready params:
      * hidden dims zero-padded up to multiples of 8,
      * output layer zero-padded from size_out -> size_padding (folds F.pad).
    """
    assert size_padding >= size_out
    prepared = []
    n = len(raw_params)
    prev_out_p = raw_params[0][0].shape[0]           # num_features (unchanged)
    for l, (w, b) in enumerate(raw_params):
        in_dim, out_dim = w.shape
        in_p = prev_out_p
        out_p = size_padding if l == n - 1 else _round_up(out_dim, 8)
        w_p = jnp.zeros((in_p, out_p), jnp.float32).at[:in_dim, :out_dim].set(w)
        b_p = jnp.zeros((1, out_p), jnp.float32).at[:, :out_dim].set(b)
        prepared.append((w_p, b_p))
        prev_out_p = out_p
    return prepared


# ---------------------------------------------------------------------------
# Wrapper
# ---------------------------------------------------------------------------
def padded_encoder_fixed(x, prepared_params, *, size_padding: int,
                         tile_b: int = 2048,
                         compute_dtype=jnp.float32,
                         out_dtype=jnp.float32):
    """x: [batch, num_features] float32. prepared_params: from prepare_params."""
    batch, num_features = x.shape
    num_layers = len(prepared_params)

    # Batch tiling: sublane-aligned tile, pad batch to a tile multiple.
    tile_b = max(8, min(tile_b, _round_up(batch, 8)))
    padded_batch = _round_up(batch, tile_b)
    if padded_batch != batch:
        x = jnp.pad(x, ((0, padded_batch - batch), (0, 0)))
    x = x.astype(compute_dtype)
    nb = padded_batch // tile_b

    operands = [x]
    in_specs = [pl.BlockSpec((tile_b, num_features), lambda i: (i, 0))]
    weight_bytes = 0
    for w, b in prepared_params:
        w = w.astype(compute_dtype)
        b = b.astype(jnp.float32)
        operands += [w, b]
        # Constant index_map -> weights/biases stay VMEM-resident across steps.
        in_specs += [pl.BlockSpec(w.shape, lambda i: (0, 0)),
                     pl.BlockSpec(b.shape, lambda i: (0, 0))]
        weight_bytes += w.size * w.dtype.itemsize + b.size * b.dtype.itemsize

    flops = 2 * padded_batch * sum(int(w.shape[0]) * int(w.shape[1])
                                   for w, _ in prepared_params)
    bytes_accessed = (padded_batch * num_features * jnp.dtype(compute_dtype).itemsize
                      + padded_batch * size_padding * jnp.dtype(out_dtype).itemsize
                      + weight_bytes)

    kernel = functools.partial(padded_encoder_kernel,
                               num_layers=num_layers,
                               compute_dtype=compute_dtype)

    out = pl.pallas_call(
        kernel,
        out_shape=jax.ShapeDtypeStruct((padded_batch, size_padding), out_dtype),
        grid_spec=pltpu.PrefetchScalarGridSpec(
            num_scalar_prefetch=0,
            grid=(nb,),
            in_specs=in_specs,
            out_specs=pl.BlockSpec((tile_b, size_padding), lambda i: (i, 0)),
        ),
        compiler_params=pltpu.CompilerParams(
            dimension_semantics=("parallel",)),
        cost_estimate=pl.CostEstimate(flops=int(flops),
                                      transcendentals=0,
                                      bytes_accessed=int(bytes_accessed)),
    )(*operands)
    return out[:batch]


# ---------------------------------------------------------------------------
# Init + pure-JAX reference
# ---------------------------------------------------------------------------
def init_params(key, num_features: int, size_out: int, num_hidden: int):
    """nn.Linear-style U(-1/sqrt(fan_in), 1/sqrt(fan_in)); weights stored [in, out]."""
    hs = _hidden_sizes(num_features, size_out, num_hidden)
    dims = [num_features] + hs + [size_out]
    params = []
    for fan_in, fan_out in zip(dims[:-1], dims[1:]):
        key, kw, kb = jax.random.split(key, 3)
        bound = 1.0 / float(fan_in) ** 0.5
        w = jax.random.uniform(kw, (fan_in, fan_out), jnp.float32,
                               minval=-bound, maxval=bound)
        b = jax.random.uniform(kb, (1, fan_out), jnp.float32,
                               minval=-bound, maxval=bound)
        params.append((w, b))
    return params, hs


def reference_forward(x, raw_params, *, size_out: int, size_padding: int):
    h = x
    n = len(raw_params)
    for l, (w, b) in enumerate(raw_params):
        h = h @ w + b
        if l < n - 1:
            h = jnp.maximum(h, 0.0)
    return jnp.pad(h, ((0, 0), (0, size_padding - size_out)))


# ---------------------------------------------------------------------------
# Demo / correctness check
# ---------------------------------------------------------------------------
if __name__ == "__main__":
    # Shapes consistent with the module:
    #   num_features=32, size_out=8, size_padding=16, num_hidden=3, p=0 (eval)
    num_features, size_out, size_padding, num_hidden = 32, 8, 16, 3
    batch = 8

    key = jax.random.PRNGKey(0)
    key, kx = jax.random.split(key)
    raw_params, hidden_sizes = init_params(key, num_features, size_out, num_hidden)
    x = jax.random.normal(kx, (batch, num_features), jnp.float32)

    ref = reference_forward(x, raw_params, size_out=size_out, size_padding=size_padding)
    prepared = prepare_params(raw_params, size_out=size_out, size_padding=size_padding)

    # f32 path (exact-precision check)
    out = padded_encoder_fixed(x, prepared, size_padding=size_padding,
                               compute_dtype=jnp.float32)
    out = jax.block_until_ready(out)
    assert out.shape == (batch, size_padding), out.shape
    assert jnp.allclose(out, ref, atol=1e-5, rtol=1e-5), "f32 mismatch vs reference"
    assert jnp.all(out[:, size_out:] == 0.0), "padding region not zero (f32)"

    # bf16 compute path (v6e/v7x HBM-bandwidth optimization; f32 accumulation)
    out_bf16 = padded_encoder_fixed(x, prepared, size_padding=size_padding,
                                    compute_dtype=jnp.bfloat16)
    out_bf16 = jax.block_until_ready(out_bf16)
    assert out_bf16.shape == (batch, size_padding), out_bf16.shape
    assert jnp.allclose(out_bf16, ref, atol=5e-2, rtol=5e-2), "bf16 mismatch vs reference"
    assert jnp.all(out_bf16[:, size_out:] == 0.0), "padding region not zero (bf16)"

    print("KERNEL_OK")
</pallas_src>

<mosaic_0001>
module attributes {stable_mosaic.version = 11 : i64} {
  func.func @padded_encoder_kernel(%arg0: i32, %arg1: memref<8x32xf32, #tpu.memory_space<vmem>>, %arg2: memref<32x32xf32, #tpu.memory_space<vmem>>, %arg3: memref<1x32xf32, #tpu.memory_space<vmem>>, %arg4: memref<32x24xf32, #tpu.memory_space<vmem>>, %arg5: memref<1x24xf32, #tpu.memory_space<vmem>>, %arg6: memref<24x16xf32, #tpu.memory_space<vmem>>, %arg7: memref<1x16xf32, #tpu.memory_space<vmem>>, %arg8: memref<16x16xf32, #tpu.memory_space<vmem>>, %arg9: memref<1x16xf32, #tpu.memory_space<vmem>>, %arg10: memref<8x16xf32, #tpu.memory_space<vmem>>) attributes {dimension_semantics = [#tpu.dimension_semantics<parallel>], iteration_bounds = array<i64: 1>, scalar_prefetch = 0 : i64, scratch_operands = 0 : i64, tpu.core_type = #tpu.core_type<tc>, window_params = [{transform_indices = @transform_0, window_bounds = array<i64: 8, 32>}, {pipeline_mode = #tpu.pipeline_mode<synchronous>, transform_indices = @transform_1, window_bounds = array<i64: 32, 32>}, {pipeline_mode = #tpu.pipeline_mode<synchronous>, transform_indices = @transform_2, window_bounds = array<i64: 1, 32>}, {pipeline_mode = #tpu.pipeline_mode<synchronous>, transform_indices = @transform_3, window_bounds = array<i64: 32, 24>}, {pipeline_mode = #tpu.pipeline_mode<synchronous>, transform_indices = @transform_4, window_bounds = array<i64: 1, 24>}, {pipeline_mode = #tpu.pipeline_mode<synchronous>, transform_indices = @transform_5, window_bounds = array<i64: 24, 16>}, {pipeline_mode = #tpu.pipeline_mode<synchronous>, transform_indices = @transform_6, window_bounds = array<i64: 1, 16>}, {pipeline_mode = #tpu.pipeline_mode<synchronous>, transform_indices = @transform_7, window_bounds = array<i64: 16, 16>}, {pipeline_mode = #tpu.pipeline_mode<synchronous>, transform_indices = @transform_8, window_bounds = array<i64: 1, 16>}, {transform_indices = @transform_9, window_bounds = array<i64: 8, 16>}]} {
    %c0 = arith.constant 0 : index
    %c0_0 = arith.constant 0 : index
    %0 = vector.load %arg1[%c0, %c0_0] : memref<8x32xf32, #tpu.memory_space<vmem>>, vector<8x32xf32>
    %c0_1 = arith.constant 0 : index
    %c0_2 = arith.constant 0 : index
    %1 = vector.load %arg2[%c0_1, %c0_2] : memref<32x32xf32, #tpu.memory_space<vmem>>, vector<32x32xf32>
    %c0_3 = arith.constant 0 : index
    %c0_4 = arith.constant 0 : index
    %2 = vector.load %arg3[%c0_3, %c0_4] : memref<1x32xf32, #tpu.memory_space<vmem>>, vector<1x32xf32>
    %cst = arith.constant dense<0.000000e+00> : vector<8x32xf32>
    %3 = tpu.matmul %0, %1, %cst {dimension_numbers = #tpu.dot_dimension_numbers<[1], [0], [0], [1], [0, 0, 1, 1], [], []>} : vector<8x32xf32>, vector<32x32xf32>, vector<8x32xf32> -> vector<8x32xf32>
    %4 = vector.broadcast %2 : vector<1x32xf32> to vector<8x32xf32>
    %5 = arith.addf %3, %4 : vector<8x32xf32>
    %cst_5 = arith.constant 0.000000e+00 : f32
    %6 = vector.broadcast %cst_5 : f32 to vector<8x32xf32>
    %7 = arith.maximumf %5, %6 : vector<8x32xf32>
    %c0_6 = arith.constant 0 : index
    %c0_7 = arith.constant 0 : index
    %8 = vector.load %arg4[%c0_6, %c0_7] : memref<32x24xf32, #tpu.memory_space<vmem>>, vector<32x24xf32>
    %c0_8 = arith.constant 0 : index
    %c0_9 = arith.constant 0 : index
    %9 = vector.load %arg5[%c0_8, %c0_9] : memref<1x24xf32, #tpu.memory_space<vmem>>, vector<1x24xf32>
    %cst_10 = arith.constant dense<0.000000e+00> : vector<8x24xf32>
    %10 = tpu.matmul %7, %8, %cst_10 {dimension_numbers = #tpu.dot_dimension_numbers<[1], [0], [0], [1], [0, 0, 1, 1], [], []>} : vector<8x32xf32>, vector<32x24xf32>, vector<8x24xf32> -> vector<8x24xf32>
    %11 = vector.broadcast %9 : vector<1x24xf32> to vector<8x24xf32>
    %12 = arith.addf %10, %11 : vector<8x24xf32>
    %cst_11 = arith.constant 0.000000e+00 : f32
    %13 = vector.broadcast %cst_11 : f32 to vector<8x24xf32>
    %14 = arith.maximumf %12, %13 : vector<8x24xf32>
    %c0_12 = arith.constant 0 : index
    %c0_13 = arith.constant 0 : index
    %15 = vector.load %arg6[%c0_12, %c0_13] : memref<24x16xf32, #tpu.memory_space<vmem>>, vector<24x16xf32>
    %c0_14 = arith.constant 0 : index
    %c0_15 = arith.constant 0 : index
    %16 = vector.load %arg7[%c0_14, %c0_15] : memref<1x16xf32, #tpu.memory_space<vmem>>, vector<1x16xf32>
    %cst_16 = arith.constant dense<0.000000e+00> : vector<8x16xf32>
    %17 = tpu.matmul %14, %15, %cst_16 {dimension_numbers = #tpu.dot_dimension_numbers<[1], [0], [0], [1], [0, 0, 1, 1], [], []>} : vector<8x24xf32>, vector<24x16xf32>, vector<8x16xf32> -> vector<8x16xf32>
    %18 = vector.broadcast %16 : vector<1x16xf32> to vector<8x16xf32>
    %19 = arith.addf %17, %18 : vector<8x16xf32>
    %cst_17 = arith.constant 0.000000e+00 : f32
    %20 = vector.broadcast %cst_17 : f32 to vector<8x16xf32>
    %21 = arith.maximumf %19, %20 : vector<8x16xf32>
    %c0_18 = arith.constant 0 : index
    %c0_19 = arith.constant 0 : index
    %22 = vector.load %arg8[%c0_18, %c0_19] : memref<16x16xf32, #tpu.memory_space<vmem>>, vector<16x16xf32>
    %c0_20 = arith.constant 0 : index
    %c0_21 = arith.constant 0 : index
    %23 = vector.load %arg9[%c0_20, %c0_21] : memref<1x16xf32, #tpu.memory_space<vmem>>, vector<1x16xf32>
    %cst_22 = arith.constant dense<0.000000e+00> : vector<8x16xf32>
    %24 = tpu.matmul %21, %22, %cst_22 {dimension_numbers = #tpu.dot_dimension_numbers<[1], [0], [0], [1], [0, 0, 1, 1], [], []>} : vector<8x16xf32>, vector<16x16xf32>, vector<8x16xf32> -> vector<8x16xf32>
    %25 = vector.broadcast %23 : vector<1x16xf32> to vector<8x16xf32>
    %26 = arith.addf %24, %25 : vector<8x16xf32>
    %c0_23 = arith.constant 0 : index
    %c0_24 = arith.constant 0 : index
    %27 = vector.load %arg10[%c0_23, %c0_24] : memref<8x16xf32, #tpu.memory_space<vmem>>, vector<8x16xf32>
    tpu.vector_store %arg10[%c0_23, %c0_24], %26 {strides = array<i32>} : memref<8x16xf32, #tpu.memory_space<vmem>>, vector<8x16xf32>,
    return
  }
  func.func @transform_0(%arg0: i32) -> (i32, i32) {
    %c0_i32 = arith.constant 0 : i32
    %c0_i32_0 = arith.constant 0 : i32
    return %arg0, %c0_i32 : i32, i32
  }
  func.func @transform_1(%arg0: i32) -> (i32, i32) {
    %c0_i32 = arith.constant 0 : i32
    %c0_i32_0 = arith.constant 0 : i32
    %c0_i32_1 = arith.constant 0 : i32
    return %c0_i32, %c0_i32_0 : i32, i32
  }
  func.func @transform_2(%arg0: i32) -> (i32, i32) {
    %c0_i32 = arith.constant 0 : i32
    %c0_i32_0 = arith.constant 0 : i32
    %c0_i32_1 = arith.constant 0 : i32
    return %c0_i32, %c0_i32_0 : i32, i32
  }
  func.func @transform_3(%arg0: i32) -> (i32, i32) {
    %c0_i32 = arith.constant 0 : i32
    %c0_i32_0 = arith.constant 0 : i32
    %c0_i32_1 = arith.constant 0 : i32
    return %c0_i32, %c0_i32_0 : i32, i32
  }
  func.func @transform_4(%arg0: i32) -> (i32, i32) {
    %c0_i32 = arith.constant 0 : i32
    %c0_i32_0 = arith.constant 0 : i32
    %c0_i32_1 = arith.constant 0 : i32
    return %c0_i32, %c0_i32_0 : i32, i32
  }
  func.func @transform_5(%arg0: i32) -> (i32, i32) {
    %c0_i32 = arith.constant 0 : i32
    %c0_i32_0 = arith.constant 0 : i32
    %c0_i32_1 = arith.constant 0 : i32
    return %c0_i32, %c0_i32_0 : i32, i32
  }
  func.func @transform_6(%arg0: i32) -> (i32, i32) {
    %c0_i32 = arith.constant 0 : i32
    %c0_i32_0 = arith.constant 0 : i32
    %c0_i32_1 = arith.constant 0 : i32
    return %c0_i32, %c0_i32_0 : i32, i32
  }
  func.func @transform_7(%arg0: i32) -> (i32, i32) {
    %c0_i32 = arith.constant 0 : i32
    %c0_i32_0 = arith.constant 0 : i32
    %c0_i32_1 = arith.constant 0 : i32
    return %c0_i32, %c0_i32_0 : i32, i32
  }
  func.func @transform_8(%arg0: i32) -> (i32, i32) {
    %c0_i32 = arith.constant 0 : i32
    %c0_i32_0 = arith.constant 0 : i32
    %c0_i32_1 = arith.constant 0 : i32
    return %c0_i32, %c0_i32_0 : i32, i32
  }
  func.func @transform_9(%arg0: i32) -> (i32, i32) {
    %c0_i32 = arith.constant 0 : i32
    %c0_i32_0 = arith.constant 0 : i32
    return %arg0, %c0_i32 : i32, i32
  }
}

</mosaic_0001>

<bundles_post_ra>
// kernel: tpu_custom_call.1
= control target key start
LH: loop header
LB: loop body
LE: loop exit
PB: predicated region body
PF: predicated region fallthrough
CT: control target
= control target key end

     0   :  { %s321_s0 = inlined_call_operand.vmem [shape: f32[8,32], index: 0, kind: input, shape index: {}]   ;;  %s322_s1 = inlined_call_operand.vmem [shape: f32[32,32], index: 1, kind: input, shape index: {}]   ;;  %s323_s2 = inlined_call_operand.vmem [shape: f32[1,32], index: 2, kind: input, shape index: {}]   ;;  %s324_s3 = inlined_call_operand.vmem [shape: f32[32,24], index: 3, kind: input, shape index: {}]   ;;  %s325_s4 = inlined_call_operand.vmem [shape: f32[1,24], index: 4, kind: input, shape index: {}]   ;;  %s326_s5 = inlined_call_operand.vmem [shape: f32[24,16], index: 5, kind: input, shape index: {}]   ;;  %s327_s6 = inlined_call_operand.vmem [shape: f32[1,16], index: 6, kind: input, shape index: {}]   ;;  %s328_s7 = inlined_call_operand.vmem [shape: f32[16,16], index: 7, kind: input, shape index: {}]   ;;  %s329_s8 = inlined_call_operand.vmem [shape: f32[1,16], index: 8, kind: input, shape index: {}]   ;;  %s330_s9 = inlined_call_operand.hbm [shape: f32[8,16], index: 9, kind: output, shape index: {}]  }
   0x1   :  { %v37_v0 = vld [vmem:[%s322_s1 + $0x18] sm:$0xff]  ;;  %v36_v1 = vld [vmem:[%s322_s1 + $0x10] sm:$0xff]  ;;  %v35_v3 = vld [vmem:[%s322_s1 + $0x8] sm:$0xff] }
   0x2   :  { %58 = vmatpush.msra.mxu0 %v37_v0  ;;  %v70_v2 = vld [vmem:[%s324_s3 + $0x18] sm:$0xff] }
   0x3   :  { %90 = vmatpush.msra.mxu1 %v70_v2 }
   0x4   :  { %59 = vmatpush.msra.mxu0 %v36_v1 }
   0x5   :  { %14 = vsyncpa [#allocation3], 0  ;;  %v34_v4 = vld [vmem:[%s322_s1] sm:$0xff]  ;;  %vm42_vm0 = vcmask 261120   ;;  %v69_v6 = vld [vmem:[%s324_s3 + $0x10] sm:$0xff]  ;;  %vm106_vm1 = vcmask 195584  }
   0x6   :  { %60 = vmatpush.msra.mxu0 %v35_v3  ;;  %v33_v5 = vld [vmem:[%s321_s0] sm:$0xff]  ;;  %91 = vmatpush.msra.mxu1 %v69_v6  ;;  %v68_v7 = vld [vmem:[%s324_s3 + $0x8] sm:$0xff]  ;;  %v101_v13 = vld [vmem:[%s326_s5 + $0x10] sm:$0xff]  ;;  %vm137_vm2 = vcmask 130048   ;;  %s213_s18 = smov [#allocation2]  }
   0x7   :  { %v67_v8 = vld [vmem:[%s324_s3] sm:$0xff]  ;;  %123 = vmatpush.msra.mxu2 %v101_v13  ;;  %v100_v14 = vld [vmem:[%s326_s5 + $0x8] sm:$0xff]  ;;  %s167_s19 = sshll.u32 %s213_s18, 4  ;;  %s168_s19 = int_to_ptr.vmem [resolvable:$true] %s167_s19 }
   0x8   :  { %61 = vmatpush.msra.mxu0 %v34_v4  ;;  %92 = vmatpush.msra.mxu1 %v68_v7  ;;  %v183_v9 = vld [vmem:[%s323_s2] ss:$0 sm:$0xff]  ;;  %v132_v20 = vld [vmem:[%s328_s7 + $0x8] sm:$0xff] }
   0x9   :  { %178 = vmatmul.msk.f32.vlgmr.msra.gmra.mxu0 %vm42_vm0, %v33_v5  ;;  %124 = vmatpush.msra.mxu2 %v100_v14  ;;  %v99_v15 = vld [vmem:[%s326_s5] sm:$0xff] }
   0xa   :  { %93 = vmatpush.msra.mxu1 %v67_v8  ;;  %v184_v16 = vld [vmem:[%s325_s4] ss:$0 sm:$0xff]  ;;  %155 = vmatpush.msra.mxu3 %v132_v20 }
   0xb   :  { %125 = vmatpush.msra.mxu2 %v99_v15  ;;  %v131_v21 = vld [vmem:[%s328_s7] sm:$0xff]  ;;  %s169_s7 = sshll.u32 %s330_s9, 4  ;;  %s170_s7 = int_to_ptr.hbm [resolvable:$true] %s169_s7 }
   0xc   :  { %156 = vmatpush.msra.mxu3 %v131_v21  ;;  %v185_v22 = vld [vmem:[%s327_s6] ss:$0 sm:$0xff] }
   0xd   :  { %v186_v26 = vld [vmem:[%s329_s8] ss:$0 sm:$0xff] }
  0x86   :  { %v63_v10 = vpop.f32.mrf.mxu0 }
  0x87   :  { %v64_v11 = vadd.f32 %v183_v9, %v63_v10 }
  0x89   :  { %v66_v12 = vmax.f32 %v64_v11, 0.0 }
  0x8b   :  { %179 = vmatmul.msk.f32.vlgmr.msra.gmra.mxu1 %vm42_vm0, %v66_v12 }
 0x108   :  { %v95_v17 = vpop.f32.mrf.mxu1 }
 0x109   :  { %v96_v18 = vadd.f32 %v184_v16, %v95_v17 }
 0x10b   :  { %v98_v19 = vmax.f32 %v96_v18, 0.0 }
 0x10d   :  { %180 = vmatmul.msk.f32.vlgmr.msra.gmra.mxu2 %vm106_vm1, %v98_v19 }
 0x190   :  { %v127_v23 = vpop.f32.mrf.mxu2 }
 0x191   :  { %v128_v24 = vadd.f32 %v185_v22, %v127_v23 }
 0x193   :  { %v130_v25 = vmax.f32 %v128_v24, 0.0 }
 0x195   :  { %181 = vmatmul.msk.f32.vlgmr.msra.gmra.mxu3 %vm137_vm2, %v130_v25 }
 0x218   :  { %v158_v27 = vpop.f32.mrf.mxu3 }
 0x219   :  { %v159_v28 = vadd.f32 %v186_v26, %v158_v27 }
 0x21b   :  { %161 = vst.msk [vmem:[#allocation2] sm:$0xff] %vm137_vm2, %v159_v28 }
 0x21c   :  { %172 = dma.vmem_to_hbm [thread:$0]  %s168_s19, 128, %s170_s7, [#allocation3]  }
 0x21d   :  { %211 = dma.done.wait [#allocation3], 128  }
 0x21e   :  { %212 = vsyncadd [#allocation3], 4294967168 }
 0x21f   :  { %177 = vsyncpa [#allocation3], 1 }

</bundles_post_ra>
